<compile_context>
chip_gen: v7x
topology: tpu7x:2x2x1
jax: 0.10.0
libtpu: 0.0.40
codegen_flags: <defaults>
</compile_context>

<pallas_src>
import functools
import math

import jax
import jax.numpy as jnp
from jax.experimental import pallas as pl
from jax.experimental.pallas import tpu as pltpu


def _round_up(x, m):
    return ((x + m - 1) // m) * m


# ----------------------------------------------------------------------------
# Kernel: masked (trainable) ReLU over one lane-block of the flattened tensor
# ----------------------------------------------------------------------------
def _trainable_relu_kernel(x_ref, mask_ref, o_ref, *, threshold):
    """x_ref: (N, cb) activation block; mask_ref: (1, cb) raw mask params."""
    x = x_ref[...]
    m = mask_ref[...]
    gate = 1.0 / (1.0 + jnp.exp(-m))          # sigmoid on the EUP (free slot)
    relu_on = gate >= threshold               # (1, cb) -> broadcasts over rows
    o_ref[...] = jnp.where(relu_on, jnp.maximum(x, 0.0), x)


# ----------------------------------------------------------------------------
# Wrapper
# ----------------------------------------------------------------------------
def trainable_relu_pixelwise(x, mask, *, threshold=0.5, block_cols=512):
    """Apply TrainableReLUPixelWise.forward.

    x:    (N, *feat) activation, any float dtype (kept as-is).
    mask: (*feat)    trainable mask parameter (pixel-wise, matches x.shape[1:]).
    """
    assert mask.shape == x.shape[1:], (mask.shape, x.shape)
    N = x.shape[0]
    P = math.prod(x.shape[1:])

    # Flatten so the feature axis sits on lanes (lane-dense loads/stores).
    x2d = x.reshape(N, P)
    m2d = mask.reshape(1, P).astype(jnp.float32)

    # Lane-block size: multiple of 128, >= 2 parallel steps for big tensors.
    cb = min(block_cols, _round_up(P, 128))
    Pp = _round_up(P, cb)
    if Pp != P:
        x2d = jnp.pad(x2d, ((0, 0), (0, Pp - P)))
        m2d = jnp.pad(m2d, ((0, 0), (0, Pp - P)))

    y2d = pl.pallas_call(
        functools.partial(_trainable_relu_kernel, threshold=float(threshold)),
        out_shape=jax.ShapeDtypeStruct((N, Pp), x.dtype),
        grid_spec=pltpu.PrefetchScalarGridSpec(
            num_scalar_prefetch=0,
            grid=(Pp // cb,),
            in_specs=[
                pl.BlockSpec((N, cb), lambda j: (0, j)),   # activation block
                pl.BlockSpec((1, cb), lambda j: (0, j)),   # mask block
            ],
            out_specs=pl.BlockSpec((N, cb), lambda j: (0, j)),
        ),
        compiler_params=pltpu.CompilerParams(
            dimension_semantics=("parallel",)),
    )(x2d, m2d)

    if Pp != P:
        y2d = y2d[:, :P]
    return y2d.reshape(x.shape)


# Single jit over the whole forward (no per-op jits).
@functools.partial(jax.jit, static_argnames=("threshold",))
def forward(x, mask, threshold=0.5):
    return trainable_relu_pixelwise(x, mask, threshold=threshold)


if __name__ == "__main__":
    key = jax.random.PRNGKey(0)
    kx, km = jax.random.split(key)

    N, C, H, W = 2, 4, 16, 16
    x = jax.random.normal(kx, (N, C, H, W), jnp.float32)
    # PyTorch init: (-1 - 1) * rand(mask_shape) + 1  ==  Uniform(-1, 1]
    mask = jax.random.uniform(km, (C, H, W), jnp.float32, -1.0, 1.0)

    out = jax.block_until_ready(forward(x, mask, threshold=0.5))

    # Pure-JAX reference (same semantics as the PyTorch module).
    relu_on = (1.0 / (1.0 + jnp.exp(-mask))) >= 0.5
    ref = jnp.where(relu_on[None], jnp.maximum(x, 0.0), x)

    assert out.shape == x.shape, out.shape
    assert bool(jnp.all(jnp.isfinite(out)))
    assert bool(jnp.allclose(out, ref, rtol=1e-6, atol=1e-6))
    print("KERNEL_OK")
</pallas_src>

<mosaic_0001>
module attributes {stable_mosaic.version = 11 : i64} {
  func.func @_trainable_relu_kernel(%arg0: i32, %arg1: memref<2x512xf32, #tpu.memory_space<vmem>>, %arg2: memref<1x512xf32, #tpu.memory_space<vmem>>, %arg3: memref<2x512xf32, #tpu.memory_space<vmem>>) attributes {dimension_semantics = [#tpu.dimension_semantics<parallel>], iteration_bounds = array<i64: 2>, scalar_prefetch = 0 : i64, scratch_operands = 0 : i64, tpu.core_type = #tpu.core_type<tc>, window_params = [{transform_indices = @transform_0, window_bounds = array<i64: 2, 512>}, {transform_indices = @transform_1, window_bounds = array<i64: 1, 512>}, {transform_indices = @transform_2, window_bounds = array<i64: 2, 512>}]} {
    %c0 = arith.constant 0 : index
    %c0_0 = arith.constant 0 : index
    %0 = vector.load %arg1[%c0, %c0_0] : memref<2x512xf32, #tpu.memory_space<vmem>>, vector<2x512xf32>
    %c0_1 = arith.constant 0 : index
    %c0_2 = arith.constant 0 : index
    %1 = vector.load %arg2[%c0_1, %c0_2] : memref<1x512xf32, #tpu.memory_space<vmem>>, vector<1x512xf32>
    %cst = arith.constant 0.000000e+00 : f32
    %2 = vector.broadcast %cst : f32 to vector<1x512xf32>
    %3 = arith.subf %2, %1 : vector<1x512xf32>
    %4 = math.exp %3 : vector<1x512xf32>
    %cst_3 = arith.constant 1.000000e+00 : f32
    %5 = vector.broadcast %cst_3 : f32 to vector<1x512xf32>
    %6 = arith.addf %5, %4 : vector<1x512xf32>
    %cst_4 = arith.constant 1.000000e+00 : f32
    %7 = vector.broadcast %cst_4 : f32 to vector<1x512xf32>
    %8 = arith.divf %7, %6 : vector<1x512xf32>
    %cst_5 = arith.constant 5.000000e-01 : f32
    %9 = vector.broadcast %cst_5 : f32 to vector<1x512xf32>
    %10 = arith.cmpf oge, %8, %9 : vector<1x512xf32>
    %cst_6 = arith.constant 0.000000e+00 : f32
    %11 = vector.broadcast %cst_6 : f32 to vector<2x512xf32>
    %12 = arith.maximumf %0, %11 : vector<2x512xf32>
    %13 = vector.shape_cast %10 : vector<1x512xi1> to vector<1x512xi1>
    %14 = vector.broadcast %13 : vector<1x512xi1> to vector<2x512xi1>
    %15 = arith.select %14, %12, %0 : vector<2x512xi1>, vector<2x512xf32>
    %c0_7 = arith.constant 0 : index
    %c0_8 = arith.constant 0 : index
    %16 = vector.load %arg3[%c0_7, %c0_8] : memref<2x512xf32, #tpu.memory_space<vmem>>, vector<2x512xf32>
    tpu.vector_store %arg3[%c0_7, %c0_8], %15 {strides = array<i32>} : memref<2x512xf32, #tpu.memory_space<vmem>>, vector<2x512xf32>,
    return
  }
  func.func @transform_0(%arg0: i32) -> (i32, i32) {
    %c0_i32 = arith.constant 0 : i32
    %c0_i32_0 = arith.constant 0 : i32
    return %c0_i32, %arg0 : i32, i32
  }
  func.func @transform_1(%arg0: i32) -> (i32, i32) {
    %c0_i32 = arith.constant 0 : i32
    %c0_i32_0 = arith.constant 0 : i32
    return %c0_i32, %arg0 : i32, i32
  }
  func.func @transform_2(%arg0: i32) -> (i32, i32) {
    %c0_i32 = arith.constant 0 : i32
    %c0_i32_0 = arith.constant 0 : i32
    return %c0_i32, %arg0 : i32, i32
  }
}

</mosaic_0001>

<bundles_post_ra>
// kernel: forward.1
= control target key start
LH: loop header
LB: loop body
LE: loop exit
PB: predicated region body
PF: predicated region fallthrough
CT: control target
= control target key end

     0   :  { %s385_s9 = smov 0   ;;  %s413_s0 = inlined_call_operand.vmem [shape: f32[2,1024], index: 0, kind: input, shape index: {}]   ;;  %s414_s1 = inlined_call_operand.vmem [shape: f32[1,1024], index: 1, kind: input, shape index: {}]   ;;  %s415_s2 = inlined_call_operand.vmem [shape: f32[2,1024], index: 2, kind: output, shape index: {}]  }
   0x1 LB: > { %s333_s10 = sadd.s32 4294967295, %s366_s9   ;;  %p337_p0 = scmp.ge.s32.totalorder %s366_s9, 1  ;;  %s366_s9 = sphi %s385_s9, %s12_s9  }
   0x2   : > { %p123_p1 = scmp.lt.s32.totalorder %s366_s9, 3 }
   0x4   : > { %p124_p2 = pnand %p337_p0, %p123_p1 }
   0x5   : > { %s338_s11 = sshll.u32 (!%p124_p2), %s333_s10, 2  ;;  %v177_v3 = vlaneseq (!%p124_p2)  ;;  %v368_v4 = vmov (!%p124_p2), 1983009808   ;;  %v369_v25 = vmov (!%p124_p2), 0  }
   0x6   : > { %127 = sbr.rel (%p124_p2) target bundleno = 57 (0x39), region = 28  ;;  %p150_p3 = scmp.lt.s32.totalorder (!%p124_p2), %s338_s11, 7  ;;  %v200_v5 = vunpack.c.l.s4 (!%p124_p2), %v368_v4 }
   0x7   : > { %v178_v9 = vshrl.u32 (!%p124_p2), %v177_v3, 7 }
   0x8   : > { %v201_v10 = vunpack.c.0.s8 (!%p124_p2), %v200_v5 }
   0x9   : > { %v179_v19 = vsub.s32 (!%p124_p2), 0, %v178_v9  ;;  %v183_v20 = vsub.s32 (!%p124_p2), 1, %v178_v9  ;;  %v187_v21 = vsub.s32 (!%p124_p2), 2, %v178_v9  ;;  %v191_v22 = vsub.s32 (!%p124_p2), 3, %v178_v9 }
   0xa   : > { %v204_v12 = vsub.s32 (!%p124_p2), %v201_v10, %v178_v9 }
   0xd   : > { %s417_s11 = smov (!%p150_p3, %s338_s11), 7 }
   0xe   : > { %s158_s14 = scalar_lea.vmem %s414_s1, %s417_s11  ;;  %s339_s15 = sshll.u32 %s417_s11, 1 }
   0xf   : > { %v167_v0 = vld [vmem:[%s158_s14] sm:$0xf]  ;;  %s153_s18 = scalar_lea.vmem %s413_s0, %s339_s15  ;;  %s164_s21 = scalar_lea.vmem %s415_s2, %s339_s15 }
  0x10   : > { %v168_v1 = vsub.f32 0.0, %v167_v0  ;;  %v166_v7 = vld [vmem:[%s153_s18] sm:$0xff] }
  0x11   : > { %v175_v11 = vmax.f32 %v166_v7, 0.0  ;;  %v220_v14 = vcombine.high %v166_v7, %v166_v7  ;;  %v227_v15 = vrot.slane %v166_v7, %v204_v12 }
  0x12   : > { %v169_v2 = vmul.f32 1.442695, %v168_v1 }
  0x13   : > { %v198_v13 = vcombine.high %v175_v11, %v175_v11  ;;  %v205_v16 = vrot.slane %v175_v11, %v204_v12  ;;  %v234_v18 = vrot.slane %v220_v14, %v204_v12  ;;  %v235_v24 = vcombine.high %v227_v15, %v227_v15 }
  0x14   : > { %356 = vpow2.f32 %v169_v2 }
  0x15   : > { %v212_v17 = vrot.slane %v198_v13, %v204_v12  ;;  %v213_v27 = vcombine.high %v205_v16, %v205_v16  ;;  %v236_v29 = vcombine.high %v234_v18, %v234_v18 }
  0x17   : > { %v214_v28 = vcombine.high %v212_v17, %v212_v17 }
  0x1e   : > { %v357_v6 = vpop.eup %356 }
  0x1f   : > { %v171_v8 = vadd.f32 1.0, %v357_v6 }
  0x21   : > { %358 = vrcp.f32 %v171_v8 }
  0x2b   : > { %v359_v23 = vpop.eup %358 }
  0x2c   : > { %vm174_vm0 = vcmp.ge.f32.partialorder %v359_v23, 0.5 }
  0x2d   : > { %v176_v26 = vsel %vm174_vm0, 1, %v369_v25 }
  0x2e   : > { %v180_v30 = vrot.slane %v176_v26, %v179_v19  ;;  %v184_v31 = vrot.slane %v176_v26, %v183_v20  ;;  %v188_v32 = vrot.slane %v176_v26, %v187_v21  ;;  %v192_v33 = vrot.slane %v176_v26, %v191_v22 }
  0x30   : > { %vm193_vm1 = vcmp.eq.s32.totalorder %v180_v30, 1  ;;  %vm194_vm2 = vcmp.eq.s32.totalorder %v184_v31, 1  ;;  %vm195_vm3 = vcmp.eq.s32.totalorder %v188_v32, 1  ;;  %vm196_vm4 = vcmp.eq.s32.totalorder %v192_v33, 1 }
  0x31   : > { %v241_v34 = vsel %vm193_vm1, %v205_v16, %v227_v15  ;;  %v242_v35 = vsel %vm194_vm2, %v213_v27, %v235_v24  ;;  %v243_v36 = vsel %vm195_vm3, %v212_v17, %v234_v18  ;;  %v244_v37 = vsel %vm196_vm4, %v214_v28, %v236_v29 }
  0x32   : > { %v249_v38 = vcombine.low %v241_v34, %v242_v35  ;;  %v250_v39 = vcombine.low %v243_v36, %v244_v37 }
  0x34   : > { %v257_v40 = vrot.slane %v249_v38, %v204_v12  ;;  %v264_v41 = vrot.slane %v250_v39, %v204_v12 }
  0x36   : > { %v265_v42 = vcombine.low %v257_v40, %v264_v41 }
  0x38   : > { %267 = vst [vmem:[%s164_s21] sm:$0xff] %v265_v42 }
  0x39 PF: > { %s12_s9 = sadd.s32 1, %s366_s9  }
  0x3a   : > { %p9_p4 = scmp.ge.s32.totalorder %s12_s9, 4  }
  0x3c   :  { %11 = sbr.rel (!%p9_p4) target bundleno = 1 (0x1), region = 61 }

</bundles_post_ra>
